<compile_context>
chip_gen: v6e
topology: v6e:2x2x1
jax: 0.10.0
libtpu: 0.0.40
codegen_flags: <defaults>
</compile_context>

<pallas_src>
import functools

import jax
import jax.numpy as jnp
from jax.experimental import pallas as pl
from jax.experimental.pallas import tpu as pltpu


def _round_up(x, m):
    return ((x + m - 1) // m) * m


def softmax_xent_kernel(x_ref, t_ref, o_ref, *, n_rows):
    # x_ref: (TN, C) logits tile (native dtype), classes lane-dense.
    # t_ref: (TN, 1) int32 labels tile.
    # o_ref: (TN, 1) f32 per-row loss; rows >= n_rows are written as 0.
    i = pl.program_id(0)
    x = x_ref[...].astype(jnp.float32)                                   # (TN, C)
    tn, c = x.shape

    # Numerically stable logsumexp over the class (lane) axis.
    m = jnp.max(x, axis=-1, keepdims=True)                               # (TN, 1)
    lse = m + jnp.log(jnp.sum(jnp.exp(x - m), axis=-1, keepdims=True))   # (TN, 1)

    # Vectorized one-hot gather of the target logit (no scalar loop,
    # no one-hot matrix ever touches HBM).
    cls = jax.lax.broadcasted_iota(jnp.int32, (tn, c), 1)
    tgt = jnp.sum(jnp.where(cls == t_ref[...], x, 0.0),
                  axis=-1, keepdims=True)                                # (TN, 1)

    # Mask rows belonging to the partial last tile / output padding.
    row = i * tn + jax.lax.broadcasted_iota(jnp.int32, (tn, 1), 0)
    o_ref[...] = jnp.where(row < n_rows, lse - tgt, 0.0)


def softmax_cross_entropy_loss(inputs, targets, *, max_block_rows=2048):
    """inputs: (N, C) float logits (any float dtype); targets: (N,) int labels.
    Returns the scalar f32 mean cross-entropy (PyTorch reference semantics)."""
    n, c = inputs.shape
    itemsize = jnp.dtype(inputs.dtype).itemsize

    # Row tile: multiple of 8 sublanes, sized so one logits tile is ~2 MiB
    # (mem-bound sweet spot), capped by max_block_rows and by the row count.
    target_tile_bytes = 2 * 1024 * 1024
    tn = target_tile_bytes // max(c * itemsize, 1)
    tn = max(8, min(tn, max_block_rows))
    tn = (tn // 8) * 8
    tn = min(tn, _round_up(max(n, 1), 8))

    grid = pl.cdiv(n, tn)
    n_pad = grid * tn  # padded output rows are written as exact zeros

    # Targets are tiny: cast/reshape is negligible. Logits pass through untouched.
    t = targets.astype(jnp.int32).reshape(n, 1)

    # Scoped-VMEM budget: double-buffered tiles + f32 in-kernel temps + headroom,
    # clamped to stay comfortably inside v7x's 64 MiB per-core VMEM.
    est = 2 * (tn * c * itemsize + tn * 4 + tn * 4) + 4 * tn * c * 4
    vmem_limit = int(min(max(est + (8 << 20), 16 << 20), 40 << 20))

    per_row = pl.pallas_call(
        functools.partial(softmax_xent_kernel, n_rows=n),
        out_shape=jax.ShapeDtypeStruct((n_pad, 1), jnp.float32),
        grid=(grid,),
        in_specs=[
            pl.BlockSpec((tn, c), lambda i: (i, 0)),
            pl.BlockSpec((tn, 1), lambda i: (i, 0)),
        ],
        out_specs=pl.BlockSpec((tn, 1), lambda i: (i, 0)),
        compiler_params=pltpu.CompilerParams(
            dimension_semantics=("parallel",),  # independent tiles -> megacore on v7x
            vmem_limit_bytes=vmem_limit,
        ),
    )(inputs, t)

    # Tiny (n_pad, 1) f32 array; padded rows are zeros so a plain sum is exact.
    return jnp.sum(per_row) / jnp.float32(n)


def reference_loss(inputs, targets):
    """Pure-JAX mirror of the PyTorch forward."""
    x = inputs.astype(jnp.float32)
    exps = jnp.exp(x)
    log_softmax = jnp.log(exps) - jnp.log(jnp.sum(exps, axis=1, keepdims=True))
    onehot = (targets[:, None] == jnp.arange(x.shape[1])[None, :]).astype(x.dtype)
    return -jnp.sum(onehot * log_softmax) / x.shape[0]


if __name__ == "__main__":
    key = jax.random.PRNGKey(0)
    k_x, k_t = jax.random.split(key)

    # Primary case: batch of 32 samples, 10 classes.
    N, C = 32, 10
    inputs = jax.random.normal(k_x, (N, C), dtype=jnp.float32)
    targets = jax.random.randint(k_t, (N,), 0, C, dtype=jnp.int32)

    loss = jax.block_until_ready(softmax_cross_entropy_loss(inputs, targets))
    ref = jax.block_until_ready(reference_loss(inputs, targets))
    assert loss.shape == (), loss.shape
    assert jnp.allclose(loss, ref, atol=1e-5, rtol=1e-5), (float(loss), float(ref))

    # Partial-last-tile case: N not a multiple of 8 / of the row tile.
    N2, C2 = 50, 17
    x2 = jax.random.normal(k_x, (N2, C2), dtype=jnp.float32)
    t2 = jax.random.randint(k_t, (N2,), 0, C2, dtype=jnp.int32)
    loss2 = jax.block_until_ready(softmax_cross_entropy_loss(x2, t2))
    ref2 = jax.block_until_ready(reference_loss(x2, t2))
    assert jnp.allclose(loss2, ref2, atol=1e-5, rtol=1e-5), (float(loss2), float(ref2))

    print("KERNEL_OK")
</pallas_src>

<mosaic_0001>
module attributes {stable_mosaic.version = 11 : i64} {
  func.func @softmax_xent_kernel(%arg0: i32, %arg1: memref<32x10xf32, #tpu.memory_space<vmem>>, %arg2: memref<32x1xi32, #tpu.memory_space<vmem>>, %arg3: memref<32x1xf32, #tpu.memory_space<vmem>>) attributes {dimension_semantics = [#tpu.dimension_semantics<parallel>], iteration_bounds = array<i64: 1>, scalar_prefetch = 0 : i64, scratch_operands = 0 : i64, tpu.core_type = #tpu.core_type<tc>, window_params = [{transform_indices = @transform_0, window_bounds = array<i64: 32, 10>}, {transform_indices = @transform_1, window_bounds = array<i64: 32, 1>}, {transform_indices = @transform_2, window_bounds = array<i64: 32, 1>}]} {
    %c0 = arith.constant 0 : index
    %c0_0 = arith.constant 0 : index
    %0 = vector.load %arg1[%c0, %c0_0] : memref<32x10xf32, #tpu.memory_space<vmem>>, vector<32x10xf32>
    %cst = arith.constant dense<0xFF800000> : vector<32xf32>
    %1 = vector.multi_reduction <maximumf>, %0, %cst [1] : vector<32x10xf32> to vector<32xf32>
    %2 = vector.shape_cast %1 : vector<32xf32> to vector<32x1xf32>
    %3 = vector.broadcast %2 : vector<32x1xf32> to vector<32x10xf32>
    %4 = arith.subf %0, %3 : vector<32x10xf32>
    %5 = math.exp %4 : vector<32x10xf32>
    %cst_1 = arith.constant dense<0.000000e+00> : vector<32xf32>
    %6 = vector.multi_reduction <add>, %5, %cst_1 [1] : vector<32x10xf32> to vector<32xf32>
    %7 = vector.shape_cast %6 : vector<32xf32> to vector<32x1xf32>
    %8 = math.log %7 : vector<32x1xf32>
    %9 = arith.addf %2, %8 : vector<32x1xf32>
    %10 = tpu.iota {dimensions = array<i32: 1>} : vector<32x10xi32>
    %c0_2 = arith.constant 0 : index
    %c0_3 = arith.constant 0 : index
    %11 = vector.load %arg2[%c0_2, %c0_3] : memref<32x1xi32, #tpu.memory_space<vmem>>, vector<32x1xi32>
    %12 = vector.broadcast %11 : vector<32x1xi32> to vector<32x10xi32>
    %13 = arith.cmpi eq, %10, %12 : vector<32x10xi32>
    %cst_4 = arith.constant 0.000000e+00 : f32
    %14 = vector.broadcast %cst_4 : f32 to vector<32x10xf32>
    %15 = arith.select %13, %0, %14 : vector<32x10xi1>, vector<32x10xf32>
    %cst_5 = arith.constant dense<0.000000e+00> : vector<32xf32>
    %16 = vector.multi_reduction <add>, %15, %cst_5 [1] : vector<32x10xf32> to vector<32xf32>
    %17 = vector.shape_cast %16 : vector<32xf32> to vector<32x1xf32>
    %c32_i32 = arith.constant 32 : i32
    %18 = arith.muli %arg0, %c32_i32 : i32
    %19 = tpu.iota {dimensions = array<i32: 0>} : vector<32x1xi32>
    %20 = vector.broadcast %18 : i32 to vector<32x1xi32>
    %21 = arith.addi %20, %19 : vector<32x1xi32>
    %c32_i32_6 = arith.constant 32 : i32
    %22 = vector.broadcast %c32_i32_6 : i32 to vector<32x1xi32>
    %23 = arith.cmpi slt, %21, %22 : vector<32x1xi32>
    %24 = arith.subf %9, %17 : vector<32x1xf32>
    %cst_7 = arith.constant 0.000000e+00 : f32
    %25 = vector.broadcast %cst_7 : f32 to vector<32x1xf32>
    %26 = arith.select %23, %24, %25 : vector<32x1xi1>, vector<32x1xf32>
    %c0_8 = arith.constant 0 : index
    %c0_9 = arith.constant 0 : index
    %27 = vector.load %arg3[%c0_8, %c0_9] : memref<32x1xf32, #tpu.memory_space<vmem>>, vector<32x1xf32>
    tpu.vector_store %arg3[%c0_8, %c0_9], %26 {strides = array<i32>} : memref<32x1xf32, #tpu.memory_space<vmem>>, vector<32x1xf32>,
    return
  }
  func.func @transform_0(%arg0: i32) -> (i32, i32) {
    %c0_i32 = arith.constant 0 : i32
    %c0_i32_0 = arith.constant 0 : i32
    return %arg0, %c0_i32 : i32, i32
  }
  func.func @transform_1(%arg0: i32) -> (i32, i32) {
    %c0_i32 = arith.constant 0 : i32
    %c0_i32_0 = arith.constant 0 : i32
    return %arg0, %c0_i32 : i32, i32
  }
  func.func @transform_2(%arg0: i32) -> (i32, i32) {
    %c0_i32 = arith.constant 0 : i32
    %c0_i32_0 = arith.constant 0 : i32
    return %arg0, %c0_i32 : i32, i32
  }
}

</mosaic_0001>

<bundles_post_ra>
// kernel: tpu_custom_call.1
= control target key start
LH: loop header
LB: loop body
LE: loop exit
PB: predicated region body
PF: predicated region fallthrough
CT: control target
= control target key end

     0   :  { %vm15_vm0 = vcmask 80896   ;;  %v153_v3 = vmov 0   ;;  %v64_v26 = vlaneseq  ;;  %vm125_vm5 = vcmask 7168   ;;  %s243_s0 = inlined_call_operand.vmem [shape: f32[32,10], index: 0, kind: input, shape index: {}]   ;;  %s244_s1 = inlined_call_operand.vmem [shape: s32[32,1], index: 1, kind: input, shape index: {}]   ;;  %s245_s2 = inlined_call_operand.vmem [shape: f32[32,1], index: 2, kind: output, shape index: {}]  }
   0x1   :  { %v11_v0 = vld [vmem:[%s243_s0] sm:$0xff]  ;;  %v13_v1 = vld [vmem:[%s243_s0 + $0x10] sm:$0xff]  ;;  %v178_v2 = vld [vmem:[%s243_s0 + $0x8] sm:$0xff]  ;;  %136 = vset.pattern.permute.xlu1 %v153_v3  ;;  %135 = vset.pattern.permute.xlu0 %v153_v3 }
   0x2   :  { %v16_v4 = vsel %vm15_vm0, %v11_v0, -inf  ;;  %v22_v5 = vsel %vm15_vm0, %v13_v1, -inf  ;;  %v185_v6 = vld [vmem:[%s243_s0 + $0x18] sm:$0xff]  ;;  %v19_v7 = vsel %vm15_vm0, %v178_v2, -inf  ;;  %v67_v9 = vld [vmem:[%s244_s1 + $0x8] sm:$0xff]  ;;  %v68_v10 = vld [vmem:[%s244_s1 + $0x10] sm:$0xff] }
   0x3   :  { %17 = vmax.xlane.f32.xlu0 %v16_v4  ;;  %23 = vmax.xlane.f32.xlu1 %v22_v5  ;;  %v25_v8 = vsel %vm15_vm0, %v185_v6, -inf  ;;  %v66_v11 = vld [vmem:[%s244_s1] sm:$0xff]  ;;  %v69_v12 = vld [vmem:[%s244_s1 + $0x18] sm:$0xff]  ;;  %v65_v27 = vand.u32 127, %v64_v26 }
   0x7   :  { %20 = vmax.xlane.f32.xlu0 %v19_v7  ;;  %26 = vmax.xlane.f32.xlu1 %v25_v8 }
  0x18   :  { %74 = vperm.xlu1 %136, %v67_v9  }
  0x1c   :  { %77 = vperm.xlu1 %136, %v68_v10  }
  0x1d   :  { %71 = vperm.xlu0 %135, %v66_v11  }
  0x20   :  { %80 = vperm.xlu1 %136, %v69_v12  }
  0x8c   :  { %v18_v13 = vpop.xlane.xlu0 %17  ;;  %v203_v14 = vpop.xlane.xlu1 %23 }
  0x8d   :  { %v28_v15 = vsub.f32 %v11_v0, %v18_v13  ;;  %v30_v16 = vsub.f32 %v13_v1, %v203_v14 }
  0x8f   :  { %v32_v17 = vmul.f32 1.442695, %v28_v15  ;;  %v36_v18 = vmul.f32 1.442695, %v30_v16 }
  0x90   :  { %v206_v19 = vpop.xlane.xlu0 %20  ;;  %v208_v20 = vpop.xlane.xlu1 %26 }
  0x91   :  { %137 = vpow2.f32 %v32_v17  ;;  %v29_v21 = vsub.f32 %v178_v2, %v206_v19  ;;  %v31_v22 = vsub.f32 %v185_v6, %v208_v20 }
  0x92   :  { %139 = vpow2.f32 %v36_v18 }
  0x93   :  { %v34_v23 = vmul.f32 1.442695, %v29_v21  ;;  %v38_v24 = vmul.f32 1.442695, %v31_v22 }
  0x94   :  { %v75_v25 = vpop.permute.xlu1 %74 }
  0x95   :  { %141 = vpow2.f32 %v34_v23  ;;  %vm83_vm3 = vcmp.eq.s32.totalorder %v65_v27, %v75_v25 }
  0x96   :  { %143 = vpow2.f32 %v38_v24  ;;  %v87_v43 = vsel %vm83_vm3, %v178_v2, 0.0 }
  0x97   :  { %v93_v44 = vsel %vm15_vm0, %v87_v43, 0.0 }
  0x98   :  { %v78_v29 = vpop.permute.xlu1 %77  ;;  %v72_v32 = vpop.permute.xlu0 %71 }
  0x99   :  { %vm84_vm1 = vcmp.eq.s32.totalorder %v65_v27, %v78_v29  ;;  %vm82_vm2 = vcmp.eq.s32.totalorder %v65_v27, %v72_v32 }
  0x9a   :  { %v88_v35 = vsel %vm84_vm1, %v13_v1, 0.0  ;;  %v86_v40 = vsel %vm82_vm2, %v11_v0, 0.0 }
  0x9b   :  { %v96_v39 = vsel %vm15_vm0, %v88_v35, 0.0  ;;  %v90_v41 = vsel %vm15_vm0, %v86_v40, 0.0 }
  0x9c   :  { %v81_v42 = vpop.permute.xlu1 %80 }
  0x9d   :  { %vm85_vm4 = vcmp.eq.s32.totalorder %v65_v27, %v81_v42 }
  0x9e   :  { %v138_v28 = vpop.eup %137  ;;  %v89_v45 = vsel %vm85_vm4, %v185_v6, 0.0 }
  0x9f   :  { %v140_v30 = vpop.eup %139  ;;  %v40_v31 = vsel %vm15_vm0, %v138_v28, 0.0  ;;  %v99_v46 = vsel %vm15_vm0, %v89_v45, 0.0 }
  0xa0   :  { %41 = vadd.xlane.f32.xlu1 %v40_v31  ;;  %v46_v33 = vsel %vm15_vm0, %v140_v30, 0.0 }
  0xa2   :  { %v142_v34 = vpop.eup %141 }
  0xa3   :  { %v144_v36 = vpop.eup %143  ;;  %v43_v37 = vsel %vm15_vm0, %v142_v34, 0.0 }
  0xa4   :  { %47 = vadd.xlane.f32.xlu1 %v46_v33  ;;  %44 = vadd.xlane.f32.xlu0 %v43_v37  ;;  %v49_v38 = vsel %vm15_vm0, %v144_v36, 0.0 }
  0xa8   :  { %50 = vadd.xlane.f32.xlu1 %v49_v38  ;;  %97 = vadd.xlane.f32.xlu0 %v96_v39 }
  0xac   :  { %91 = vadd.xlane.f32.xlu1 %v90_v41 }
  0xb0   :  { %94 = vadd.xlane.f32.xlu1 %v93_v44 }
  0xb4   :  { %100 = vadd.xlane.f32.xlu1 %v99_v46 }
 0x129   :  { %v42_v47 = vpop.xlane.xlu1 %41 }
 0x12a   :  { %145 = vlog2.f32 %v42_v47 }
 0x12d   :  { %v48_v48 = vpop.xlane.xlu1 %47  ;;  %v45_v49 = vpop.xlane.xlu0 %44 }
 0x12e   :  { %147 = vlog2.f32 %v48_v48 }
 0x12f   :  { %149 = vlog2.f32 %v45_v49 }
 0x131   :  { %v51_v50 = vpop.xlane.xlu1 %50  ;;  %v98_v0 = vpop.xlane.xlu0 %97 }
 0x132   :  { %151 = vlog2.f32 %v51_v50 }
 0x135   :  { %v92_v52 = vpop.xlane.xlu1 %91 }
 0x137   :  { %v146_v51 = vpop.eup %145 }
 0x138   :  { %v53_v53 = vmul.f32 0.6931472, %v146_v51 }
 0x139   :  { %v95_v60 = vpop.xlane.xlu1 %94 }
 0x13a   :  { %v60_v54 = vadd.f32 %v53_v53, %v18_v13 }
 0x13b   :  { %v148_v55 = vpop.eup %147 }
 0x13c   :  { %v150_v56 = vpop.eup %149  ;;  %v57_v57 = vmul.f32 0.6931472, %v148_v55  ;;  %v117_v58 = vsub.f32 %v60_v54, %v92_v52 }
 0x13d   :  { %v55_v59 = vmul.f32 0.6931472, %v150_v56  ;;  %v101_v5 = vpop.xlane.xlu1 %100 }
 0x13e   :  { %126 = vst.msk [vmem:[%s245_s2] sm:$0xff] %vm125_vm5, %v117_v58  ;;  %v62_v61 = vadd.f32 %v57_v57, %v203_v14 }
 0x13f   :  { %v152_v62 = vpop.eup %151  ;;  %v61_v63 = vadd.f32 %v55_v59, %v206_v19 }
 0x140   :  { %v59_v1 = vmul.f32 0.6931472, %v152_v62  ;;  %v119_v2 = vsub.f32 %v62_v61, %v98_v0 }
 0x141   :  { %v118_v3 = vsub.f32 %v61_v63, %v95_v60 }
 0x142   :  { %128 = vst.msk [vmem:[%s245_s2 + $0x10] sm:$0xff] %vm125_vm5, %v119_v2  ;;  %v63_v4 = vadd.f32 %v59_v1, %v208_v20 }
 0x143   :  { %127 = vst.msk [vmem:[%s245_s2 + $0x8] sm:$0xff] %vm125_vm5, %v118_v3 }
 0x144   :  { %v120_v6 = vsub.f32 %v63_v4, %v101_v5 }
 0x146   :  { %129 = vst.msk [vmem:[%s245_s2 + $0x18] sm:$0xff] %vm125_vm5, %v120_v6 }

</bundles_post_ra>
